<compile_context>
chip_gen: v6e
topology: v6e:2x2x1
jax: 0.10.0
libtpu: 0.0.40
codegen_flags: <defaults>
</compile_context>

<pallas_src>
import jax
import jax.numpy as jnp
from jax.experimental import pallas as pl
from jax.experimental.pallas import tpu as pltpu


# ----------------------------------------------------------------------------
# Recurrent GRU step kernel (time loop = grid axis; hidden lives in VMEM scratch).
# PyTorch nn.GRU gate order (r, z, n):
#   r = sigmoid(gi_r + gh_r)
#   z = sigmoid(gi_z + gh_z)
#   n = tanh  (gi_n + r * gh_n)
#   h' = (1 - z) * n + z * h
# gi (the input projection x @ Wi + bi, plus any input gating) is precomputed.
# ----------------------------------------------------------------------------
def gru_step_kernel(gi_ref, wh_ref, bh_ref, out_ref, h_scr):
    t = pl.program_id(0)

    @pl.when(t == 0)
    def _init():
        h_scr[...] = jnp.zeros_like(h_scr)

    h = h_scr[...]                                  # (Bp, H) f32
    H = h.shape[-1]

    gi = gi_ref[...]                                # (Bp, 3H) f32, precomputed
    # Single fused recurrent matmul: (Bp, H) @ (H, 3H), bf16 MXU, f32 accumulate.
    gh = jnp.dot(h.astype(wh_ref.dtype), wh_ref[...],
                 preferred_element_type=jnp.float32) + bh_ref[...]

    r = jax.nn.sigmoid(gi[:, 0:H] + gh[:, 0:H])
    z = jax.nn.sigmoid(gi[:, H:2 * H] + gh[:, H:2 * H])
    n = jnp.tanh(gi[:, 2 * H:3 * H] + r * gh[:, 2 * H:3 * H])
    h_new = (1.0 - z) * n + z * h

    h_scr[...] = h_new
    out_ref[...] = h_new.astype(out_ref.dtype)


def gru_scan(gi_tbk, wh, bh):
    """gi_tbk: (T, Bp, 3H) f32 precomputed input projections (time-major).
    wh: (H, 3H) bf16, bh: (1, 3H) f32.  Returns output sequence (T, Bp, H) f32."""
    T, Bp, K3 = gi_tbk.shape
    H = K3 // 3
    return pl.pallas_call(
        gru_step_kernel,
        out_shape=jax.ShapeDtypeStruct((T, Bp, H), jnp.float32),
        grid_spec=pltpu.PrefetchScalarGridSpec(
            num_scalar_prefetch=0,
            grid=(T,),
            in_specs=[
                pl.BlockSpec((pl.Squeezed(), Bp, K3), lambda t: (t, 0, 0)),  # gi_t
                pl.BlockSpec((H, K3), lambda t: (0, 0)),                     # Wh (invariant)
                pl.BlockSpec((1, K3), lambda t: (0, 0)),                     # bh (invariant)
            ],
            out_specs=pl.BlockSpec((pl.Squeezed(), Bp, H), lambda t: (t, 0, 0)),
            scratch_shapes=[pltpu.VMEM((Bp, H), jnp.float32)],
        ),
        compiler_params=pltpu.CompilerParams(
            dimension_semantics=("arbitrary",),       # serial recurrence
            vmem_limit_bytes=32 * 1024 * 1024,
        ),
    )(gi_tbk, wh, bh)


def _input_projection(x_tbh, wi, bi):
    """One large (T*Bp, H) x (H, 3H) matmul for all time steps (hoisted out of the
    recurrent loop).  x_tbh f32, wi bf16, bi (1, 3H) f32 -> (T, Bp, 3H) f32."""
    T, Bp, H = x_tbh.shape
    gi = jnp.dot(x_tbh.reshape(T * Bp, H).astype(wi.dtype), wi,
                 preferred_element_type=jnp.float32)
    return gi.reshape(T, Bp, 3 * H) + bi


# ----------------------------------------------------------------------------
# Fused multi-task head: y = relu(h * gate) @ W_cat + b_cat
# (gate >= 0, so relu(h*g) == relu(h)*g; gate==ones gives plain relu(h).)
# All task heads concatenated along the lane dim and padded to a multiple of 128.
# ----------------------------------------------------------------------------
def head_kernel(h_ref, g_ref, w_ref, b_ref, y_ref):
    hv = jnp.maximum(h_ref[...] * g_ref[...], 0.0)
    y_ref[...] = (jnp.dot(hv.astype(w_ref.dtype), w_ref[...],
                          preferred_element_type=jnp.float32)
                  + b_ref[...]).astype(y_ref.dtype)


def heads_forward(h_bh, gate_1h, w_cat, b_cat):
    Bp, H = h_bh.shape
    Np = w_cat.shape[1]
    return pl.pallas_call(
        head_kernel,
        out_shape=jax.ShapeDtypeStruct((Bp, Np), jnp.float32),
        grid=(1,),
        in_specs=[
            pl.BlockSpec((Bp, H), lambda i: (0, 0)),
            pl.BlockSpec((1, H), lambda i: (0, 0)),
            pl.BlockSpec((H, Np), lambda i: (0, 0)),
            pl.BlockSpec((1, Np), lambda i: (0, 0)),
        ],
        out_specs=pl.BlockSpec((Bp, Np), lambda i: (0, 0)),
    )(h_bh, gate_1h, w_cat, b_cat)


# ----------------------------------------------------------------------------
# Net.forward equivalent (starting from BERT's last_hidden_state)
# ----------------------------------------------------------------------------
def net_forward(params, taskcla, t_task, sequence_output, which_type, s):
    B, T, H = sequence_output.shape
    Bp = max(8, ((B + 7) // 8) * 8)        # pad batch to full f32 sublanes

    # AC.mask: sigmoid(s * efc(t))
    gfc = jax.nn.sigmoid(s * params["efc"][t_task])[None, :].astype(jnp.float32)  # (1, H)
    ones_gate = jnp.ones((1, H), jnp.float32)

    x = sequence_output.astype(jnp.float32)
    if Bp != B:
        x = jnp.pad(x, ((0, Bp - B), (0, 0), (0, 0)))
    x_tbh = jnp.transpose(x, (1, 0, 2))    # single transpose; time-major from here on

    mcl = params["mcl"]
    gi_mcl = _input_projection(x_tbh, mcl["wi"], mcl["bi"])
    mcl_out_tbh = gru_scan(gi_mcl, mcl["wh"], mcl["bh"])        # (T, Bp, H)

    if which_type == "mcl":
        h = mcl_out_tbh[T - 1]                                   # final hidden (Bp, H)
        head_gate = ones_gate if t_task == 0 else gfc
    elif which_type == "ac":
        ac = params["ac"]
        # relu(mcl_output) * gfc feeds only the AC input projection.
        gated = jnp.maximum(mcl_out_tbh, 0.0) * gfc              # (T, Bp, H), time-major
        gi_ac = _input_projection(gated, ac["wi"], ac["bi"])
        ac_out_tbh = gru_scan(gi_ac, ac["wh"], ac["bh"])
        h = ac_out_tbh[T - 1]
        head_gate = ones_gate
    else:
        raise ValueError(which_type)

    y_cat = heads_forward(h, head_gate, params["head_w"], params["head_b"])[:B]

    ys, off = [], 0
    for _ti, n in taskcla:
        ys.append(y_cat[:, off:off + n])
        off += n
    return ys


# ----------------------------------------------------------------------------
# Deterministic parameter init (shapes follow nn.GRU / nn.Linear / nn.Embedding).
# GRU weights stored fused & transposed: (H, 3H) with gate order [r | z | n].
# ----------------------------------------------------------------------------
def init_gru_params(key, H):
    ks = jax.random.split(key, 4)
    scale = 1.0 / jnp.sqrt(H)
    return dict(
        wi=jax.random.uniform(ks[0], (H, 3 * H), jnp.float32, -scale, scale
                              ).astype(jnp.bfloat16),
        wh=jax.random.uniform(ks[1], (H, 3 * H), jnp.float32, -scale, scale
                              ).astype(jnp.bfloat16),
        bi=jax.random.uniform(ks[2], (1, 3 * H), jnp.float32, -scale, scale),
        bh=jax.random.uniform(ks[3], (1, 3 * H), jnp.float32, -scale, scale),
    )


def init_params(key, H, num_task, taskcla):
    k_mcl, k_ac, k_efc, k_heads = jax.random.split(key, 4)
    scale = 1.0 / jnp.sqrt(H)
    ws, bs = [], []
    for (_ti, n), kk in zip(taskcla, jax.random.split(k_heads, len(taskcla))):
        kw, kb = jax.random.split(kk)
        ws.append(jax.random.uniform(kw, (H, n), jnp.float32, -scale, scale))
        bs.append(jax.random.uniform(kb, (1, n), jnp.float32, -scale, scale))
    n_total = sum(n for _t, n in taskcla)
    n_pad = ((n_total + 127) // 128) * 128          # lane-dense head output
    w_cat = jnp.zeros((H, n_pad), jnp.float32).at[:, :n_total].set(
        jnp.concatenate(ws, axis=1))
    b_cat = jnp.zeros((1, n_pad), jnp.float32).at[:, :n_total].set(
        jnp.concatenate(bs, axis=1))
    return dict(
        mcl=init_gru_params(k_mcl, H),
        ac=init_gru_params(k_ac, H),
        efc=jax.random.normal(k_efc, (num_task, H), jnp.float32),
        head_w=w_cat.astype(jnp.bfloat16),
        head_b=b_cat,
    )


if __name__ == "__main__":
    key = jax.random.PRNGKey(0)
    B, T, H = 2, 8, 32            # batch, max_seq_length, bert_hidden_size
    num_task = 3
    taskcla = [(0, 3), (1, 4), (2, 5)]

    k_par, k_x = jax.random.split(key)
    params = init_params(k_par, H, num_task, taskcla)

    # Stand-in for the frozen BERT's last_hidden_state (B, T, H).
    sequence_output = jax.random.normal(k_x, (B, T, H), jnp.float32)

    y_mcl = net_forward(params, taskcla, t_task=1, sequence_output=sequence_output,
                        which_type="mcl", s=100.0)
    y_mcl_t0 = net_forward(params, taskcla, t_task=0, sequence_output=sequence_output,
                           which_type="mcl", s=1.0)
    y_ac = net_forward(params, taskcla, t_task=2, sequence_output=sequence_output,
                       which_type="ac", s=100.0)

    for y in y_mcl + y_mcl_t0 + y_ac:
        jax.block_until_ready(y)

    print("KERNEL_OK")
</pallas_src>

<mosaic_0001>
module attributes {stable_mosaic.version = 11 : i64} {
  func.func @gru_step_kernel(%arg0: i32, %arg1: memref<1x8x96xf32, #tpu.memory_space<vmem>>, %arg2: memref<32x96xbf16, #tpu.memory_space<vmem>>, %arg3: memref<1x96xf32, #tpu.memory_space<vmem>>, %arg4: memref<1x8x32xf32, #tpu.memory_space<vmem>>, %arg5: memref<8x32xf32, #tpu.memory_space<vmem>>) attributes {dimension_semantics = [#tpu.dimension_semantics<arbitrary>], iteration_bounds = array<i64: 8>, scalar_prefetch = 0 : i64, scratch_operands = 1 : i64, tpu.core_type = #tpu.core_type<tc>, window_params = [{transform_indices = @transform_0, window_bounds = array<i64: 1, 8, 96>}, {pipeline_mode = #tpu.pipeline_mode<synchronous>, transform_indices = @transform_1, window_bounds = array<i64: 32, 96>}, {pipeline_mode = #tpu.pipeline_mode<synchronous>, transform_indices = @transform_2, window_bounds = array<i64: 1, 96>}, {transform_indices = @transform_3, window_bounds = array<i64: 1, 8, 32>}]} {
    %c0_i32 = arith.constant 0 : i32
    %0 = arith.cmpi eq, %arg0, %c0_i32 : i32
    %1 = arith.extui %0 : i1 to i32
    %c0_i32_0 = arith.constant 0 : i32
    %2 = arith.cmpi ne, %1, %c0_i32_0 : i32
    scf.if %2 {
      %cst_17 = arith.constant 0.000000e+00 : f32
      %42 = vector.broadcast %cst_17 : f32 to vector<8x32xf32>
      %c0_18 = arith.constant 0 : index
      %c0_19 = arith.constant 0 : index
      %43 = vector.load %arg5[%c0_18, %c0_19] : memref<8x32xf32, #tpu.memory_space<vmem>>, vector<8x32xf32>
      tpu.vector_store %arg5[%c0_18, %c0_19], %42 {strides = array<i32>} : memref<8x32xf32, #tpu.memory_space<vmem>>, vector<8x32xf32>,
    } else {
    }
    %c0 = arith.constant 0 : index
    %c0_1 = arith.constant 0 : index
    %3 = vector.load %arg5[%c0, %c0_1] : memref<8x32xf32, #tpu.memory_space<vmem>>, vector<8x32xf32>
    %c0_2 = arith.constant 0 : index
    %c0_3 = arith.constant 0 : index
    %c0_4 = arith.constant 0 : index
    %4 = vector.load %arg1[%c0_2, %c0_3, %c0_4] : memref<1x8x96xf32, #tpu.memory_space<vmem>>, vector<1x8x96xf32>
    %5 = vector.shape_cast %4 : vector<1x8x96xf32> to vector<8x96xf32>
    %6 = arith.truncf %3 : vector<8x32xf32> to vector<8x32xbf16>
    %c0_5 = arith.constant 0 : index
    %c0_6 = arith.constant 0 : index
    %7 = vector.load %arg2[%c0_5, %c0_6] : memref<32x96xbf16, #tpu.memory_space<vmem>>, vector<32x96xbf16>
    %cst = arith.constant dense<0.000000e+00> : vector<8x96xf32>
    %8 = tpu.matmul %6, %7, %cst {dimension_numbers = #tpu.dot_dimension_numbers<[1], [0], [0], [1], [0, 0, 1, 1], [], []>} : vector<8x32xbf16>, vector<32x96xbf16>, vector<8x96xf32> -> vector<8x96xf32>
    %c0_7 = arith.constant 0 : index
    %c0_8 = arith.constant 0 : index
    %9 = vector.load %arg3[%c0_7, %c0_8] : memref<1x96xf32, #tpu.memory_space<vmem>>, vector<1x96xf32>
    %10 = vector.broadcast %9 : vector<1x96xf32> to vector<8x96xf32>
    %11 = arith.addf %8, %10 : vector<8x96xf32>
    %12 = vector.extract_strided_slice %5 {offsets = [0, 0], sizes = [8, 32], strides = [1, 1]} : vector<8x96xf32> to vector<8x32xf32>
    %13 = vector.extract_strided_slice %11 {offsets = [0, 0], sizes = [8, 32], strides = [1, 1]} : vector<8x96xf32> to vector<8x32xf32>
    %14 = arith.addf %12, %13 : vector<8x32xf32>
    %15 = arith.negf %14 : vector<8x32xf32>
    %16 = math.exp %15 : vector<8x32xf32>
    %cst_9 = arith.constant 1.000000e+00 : f32
    %17 = vector.broadcast %cst_9 : f32 to vector<8x32xf32>
    %18 = arith.addf %17, %16 : vector<8x32xf32>
    %19 = arith.divf %17, %18 : vector<8x32xf32>
    %20 = vector.extract_strided_slice %5 {offsets = [0, 32], sizes = [8, 32], strides = [1, 1]} : vector<8x96xf32> to vector<8x32xf32>
    %21 = vector.extract_strided_slice %11 {offsets = [0, 32], sizes = [8, 32], strides = [1, 1]} : vector<8x96xf32> to vector<8x32xf32>
    %22 = arith.addf %20, %21 : vector<8x32xf32>
    %23 = arith.negf %22 : vector<8x32xf32>
    %24 = math.exp %23 : vector<8x32xf32>
    %cst_10 = arith.constant 1.000000e+00 : f32
    %25 = vector.broadcast %cst_10 : f32 to vector<8x32xf32>
    %26 = arith.addf %25, %24 : vector<8x32xf32>
    %27 = arith.divf %25, %26 : vector<8x32xf32>
    %28 = vector.extract_strided_slice %5 {offsets = [0, 64], sizes = [8, 32], strides = [1, 1]} : vector<8x96xf32> to vector<8x32xf32>
    %29 = vector.extract_strided_slice %11 {offsets = [0, 64], sizes = [8, 32], strides = [1, 1]} : vector<8x96xf32> to vector<8x32xf32>
    %30 = arith.mulf %19, %29 : vector<8x32xf32>
    %31 = arith.addf %28, %30 : vector<8x32xf32>
    %32 = math.tanh %31 : vector<8x32xf32>
    %cst_11 = arith.constant 1.000000e+00 : f32
    %33 = vector.broadcast %cst_11 : f32 to vector<8x32xf32>
    %34 = arith.subf %33, %27 : vector<8x32xf32>
    %35 = arith.mulf %34, %32 : vector<8x32xf32>
    %36 = arith.mulf %27, %3 : vector<8x32xf32>
    %37 = arith.addf %35, %36 : vector<8x32xf32>
    %c0_12 = arith.constant 0 : index
    %c0_13 = arith.constant 0 : index
    %38 = vector.load %arg5[%c0_12, %c0_13] : memref<8x32xf32, #tpu.memory_space<vmem>>, vector<8x32xf32>
    tpu.vector_store %arg5[%c0_12, %c0_13], %37 {strides = array<i32>} : memref<8x32xf32, #tpu.memory_space<vmem>>, vector<8x32xf32>,
    %c0_14 = arith.constant 0 : index
    %c0_15 = arith.constant 0 : index
    %c0_16 = arith.constant 0 : index
    %39 = vector.load %arg4[%c0_14, %c0_15, %c0_16] : memref<1x8x32xf32, #tpu.memory_space<vmem>>, vector<1x8x32xf32>
    %40 = vector.shape_cast %39 : vector<1x8x32xf32> to vector<8x32xf32>
    %41 = vector.shape_cast %37 : vector<8x32xf32> to vector<1x8x32xf32>
    tpu.vector_store %arg4[%c0_14, %c0_15, %c0_16], %41 {strides = array<i32>} : memref<1x8x32xf32, #tpu.memory_space<vmem>>, vector<1x8x32xf32>,
    return
  }
  func.func @transform_0(%arg0: i32) -> (i32, i32, i32) {
    %c0_i32 = arith.constant 0 : i32
    %c0_i32_0 = arith.constant 0 : i32
    %c0_i32_1 = arith.constant 0 : i32
    return %arg0, %c0_i32, %c0_i32_0 : i32, i32, i32
  }
  func.func @transform_1(%arg0: i32) -> (i32, i32) {
    %c0_i32 = arith.constant 0 : i32
    %c0_i32_0 = arith.constant 0 : i32
    %c0_i32_1 = arith.constant 0 : i32
    return %c0_i32, %c0_i32_0 : i32, i32
  }
  func.func @transform_2(%arg0: i32) -> (i32, i32) {
    %c0_i32 = arith.constant 0 : i32
    %c0_i32_0 = arith.constant 0 : i32
    %c0_i32_1 = arith.constant 0 : i32
    return %c0_i32, %c0_i32_0 : i32, i32
  }
  func.func @transform_3(%arg0: i32) -> (i32, i32, i32) {
    %c0_i32 = arith.constant 0 : i32
    %c0_i32_0 = arith.constant 0 : i32
    %c0_i32_1 = arith.constant 0 : i32
    return %arg0, %c0_i32, %c0_i32_0 : i32, i32, i32
  }
}

</mosaic_0001>

<bundles_post_ra>
// kernel: tpu_custom_call.1
= control target key start
LH: loop header
LB: loop body
LE: loop exit
PB: predicated region body
PF: predicated region fallthrough
CT: control target
= control target key end

     0   :  { %8 = vsyncpa [#allocation4], 0  ;;  %s847_s0 = inlined_call_operand.hbm [shape: f32[8,8,96], index: 0, kind: input, shape index: {}]   ;;  %s848_s1 = inlined_call_operand.hbm [shape: bf16[32,96], index: 1, kind: input, shape index: {}]   ;;  %s849_s2 = inlined_call_operand.vmem [shape: f32[1,96], index: 2, kind: input, shape index: {}]   ;;  %s850_s3 = inlined_call_operand.hbm [shape: f32[8,8,32], index: 3, kind: output, shape index: {}]  }
   0x1   :  { %10 = vsyncpa [#allocation4 + $0x1], 0 }
   0x2   :  { %11 = vsyncpa [#allocation7], 0 }
   0x3   :  { %12 = vsyncpa [#allocation5], 0 }
   0x4   :  { %14 = vsyncpa [#allocation5 + $0x1], 0  ;;  %s667_s12 = smov 0   ;;  %s669_s13 = smov 0  }
   0x5   :  { %s671_s14 = smov 0   ;;  %s673_s15 = smov 0  }
   0x6 LB: > { %s688_s16 = sadd.s32 4294967295, %s634_s15   ;;  %s408_s17 = sadd.s32 4294967294, %s634_s15   ;;  %s634_s15 = sphi %s673_s15, %s872_s15   ;;  %s630_s14 = sphi %s671_s14, %s871_s14   ;;  %s626_s13 = sphi %s669_s13, %s870_s13   ;;  %s622_s12 = sphi %s667_s12, %s869_s12  }
   0x7   : > { %p40_p0 = scmp.ne.s32.totalorder %s626_s13, %s622_s12  ;;  %p851_p1 = scmp.eq.s32.totalorder %s688_s16, 0 }
   0x8   : > { %p112_p3 = scmp.eq.s32.totalorder %s408_s17, 7  ;;  %p409_p5 = scmp.ge.s32.totalorder %s634_s15, 1 }
   0x9   : > { %p697_p4 = por %p851_p1, %p40_p0  ;;  %p119_p7 = scmp.lt.s32.totalorder %s634_s15, 9 }
   0xa   : > { %p702_p6 = por %p112_p3, %p40_p0  ;;  %s636_s21 = smov [#allocation6]  }
   0xb   : > { %s855_s18 = scalar_select %p697_p4, 1, 0 }
   0xc   : > { %s856_s19 = scalar_select %p702_p6, 1, 0 }
   0xd   : > { %p708_p9 = pnand %p409_p5, %p119_p7  ;;  %s131_s22 = sshll.u32 %s636_s21, 4  ;;  %s132_s22 = int_to_ptr.vmem [resolvable:$true] %s131_s22 }
   0xe   : > { %s721_s24 = sadd.s32 1, %s634_s15   ;;  %s27_s25 = sadd.s32 1, %s630_s14 }
   0xf   : > { %s857_s20 = scalar_select %p708_p9, 1, 0 }
  0x10   : > { %p447_p10 = pneg %p708_p9  ;;  %s24_s26 = ssub.s32 %s634_s15, %s721_s24 }
  0x11   : > { %s523_s27 = scalar_lea.vmem %s132_s22, 256  ;;  %p531_p5 = scmp.lt.s32.totalorder %s132_s22, %s132_s22 }
  0x12   : > { %p716_p11 = pnand %p447_p10, %p851_p1  ;;  %p524_p13 = scmp.ne.s32.totalorder %s132_s22, %s523_s27 }
  0x13   : > { %p532_p7 = scmp.lt.s32.totalorder %s523_s27, %s523_s27 }
  0x14   : > { %p514_p12 = pneg %p716_p11 }
  0x15   : > { %p533_p8 = por %p532_p7, %p531_p5 }
  0x16   : > { %p526_p0 = pnand %p524_p13, %p514_p12 }
  0x18   : > { %p527_p3 = pneg %p526_p0 }
  0x1a   : > { %p534_p2 = pnand %p533_p8, %p527_p3 }
  0x1c   : > { %537 = shalt.err (!%p534_p2)
}
  0x1d   : > { %s637_s28 = smov 64   ;;  %s638_s29 = smov 4  }
  0x1e   : > { %450 = dma.hbm_to_vmem [thread:$0]  (!%p716_p11), %s848_s1, 256, %s132_s22, [#allocation7], %s637_s28, %s637_s28, %s638_s29  }
  0x1f   : > { %p25_p10 = scmp.eq.s32.totalorder %s24_s26, 0  ;;  %p34_p12 = scmp.ne.s32.totalorder %s630_s14, %s626_s13 }
  0x20   : > { %p35_p8 = scmp.eq.s32.totalorder %s634_s15, 0  ;;  %p460_p2 = scmp.lt.s32.totalorder %s634_s15, 8 }
  0x21   : > { %s738_s5 = scalar_select %p25_p10, %s630_s14, %s27_s25  }
  0x22   : > { %p36_p13 = por %p35_p8, %p34_p12  ;;  %p859_p0 = scmp.eq.s32.totalorder %s688_s16, 7 }
  0x23   : > { %s148_s7 = sand.u32 1, %s630_s14   ;;  %s413_s8 = sshll.u32 %s634_s15, 7 }
  0x24   : > { %p742_p3 = por %p859_p0, %p34_p12  ;;  %s412_s9 = sshll.u32 %s148_s7, 3 }
  0x25   : > { %s751_s17 = scalar_lea.hbm %s847_s0, %s413_s8  ;;  %s152_s21 = scalar_lea.vmem [#allocation3], %s412_s9 }
  0x26   : > { %s860_s6 = scalar_select %p742_p3, 1, 0 }
  0x27   : > { %s159_s22 = sshll.u32 %s152_s21, 4  ;;  %p753_p11 = pnand %p460_p2, %p36_p13  ;;  %s160_s22 = int_to_ptr.vmem [resolvable:$true] %s159_s22 }
  0x28   : > { %s149_s25 = scalar_lea.sflag [#allocation4], %s148_s7  ;;  %s538_s26 = scalar_lea.hbm %s751_s17, 128 }
  0x29   : > { %p539_p5 = scmp.ne.s32.totalorder %s751_s17, %s538_s26  ;;  %p540_p7 = pneg %p753_p11 }
  0x2a   : > { %s543_s29 = scalar_lea.hbm %s847_s0, 1024  ;;  %p544_p8 = scmp.lt.s32.totalorder %s751_s17, %s847_s0 }
  0x2b   : > { %p541_p10 = pnand %p540_p7, %p539_p5  ;;  %p545_p2 = scmp.lt.s32.totalorder %s543_s29, %s538_s26 }
  0x2d   : > { %p542_p12 = pneg %p541_p10  ;;  %p546_p13 = por %p545_p2, %p544_p8 }
  0x2f   : > { %p547_p0 = pnand %p546_p13, %p542_p12 }
  0x31   : > { %550 = shalt.err (!%p547_p0)
}
  0x32   : > { %s551_s8 = scalar_lea.vmem %s160_s22, 128  ;;  %s639_s7 = smov [#allocation3]  }
  0x33   : > { %p552_p1 = scmp.ne.s32.totalorder %s160_s22, %s551_s8  ;;  %s556_s9 = sshll.u32 %s639_s7, 4  ;;  %s557_s9 = int_to_ptr.vmem [resolvable:$false] %s556_s9 }
  0x34   : > { %s558_s10 = scalar_lea.vmem %s557_s9, 256  ;;  %p559_p5 = scmp.lt.s32.totalorder %s160_s22, %s557_s9 }
  0x35   : > { %p554_p6 = pnand %p552_p1, %p540_p7  ;;  %p560_p10 = scmp.lt.s32.totalorder %s558_s10, %s551_s8 }
  0x37   : > { %p555_p3 = pneg %p554_p6  ;;  %p561_p4 = por %p560_p10, %p559_p5 }
  0x39   : > { %p562_p9 = pnand %p561_p4, %p555_p3 }
  0x3b   : > { %565 = shalt.err (!%p562_p9)
}
  0x3c   : > { %454 = dma.hbm_to_vmem [thread:$0]  (!%p753_p11), %s751_s17, 128, %s160_s22, %s149_s25  }
  0x3d   : > { %p862_p12 = scmp.ne.s32.totalorder %s857_s20, 0 }
  0x3e   : > { %s774_s11 = sand.u32 (!%p862_p12), 1, %s626_s13   ;;  %p863_p1 = scmp.ne.s32.totalorder (!%p862_p12), %s855_s18, 0 }
  0x3f   : > { %168 = sbr.rel (%p862_p12) target bundleno = 784 (0x310), region = 32  ;;  %s415_s21 = sshll.u32 (!%p862_p12), %s774_s11, 3 }
  0x40   : > { %s171_s26 = scalar_lea.sflag (!%p862_p12), [#allocation4], %s774_s11  ;;  %s778_s27 = scalar_lea.vmem (!%p862_p12), [#allocation3], %s415_s21 }
  0x44   : > { %609 = dma.done.wait (%p863_p1), %s171_s26, 128  }
  0x45   : > { %611 = vsyncadd (%p863_p1), %s171_s26, 4294967168  ;;  %p864_p4 = scmp.eq.s32.totalorder %s688_s16, 0 }
  0x47   : > { %613 = dma.done.wait (%p864_p4), [#allocation7], 256   ;;  %p865_p6 = pmov %p864_p4 }
  0x48   : > { %s788_s20 = scalar_lea.vmem [#allocation8], %s415_s21  ;;  %p866_p9 = scmp.ne.s32.totalorder %s688_s16, 0 }
  0x49   : > { %615 = vsyncadd (%p865_p6), [#allocation7], 4294967040 }
  0x4a   : > { %205 = sbr.rel (%p866_p9) target bundleno = 81 (0x51), region = 44 }
  0x4f   : > { %vm206_vm0 = vcmask 261120   ;;  %v640_v0 = vmov 0.0  }
  0x50   : > { %207 = vst.msk [vmem:[#allocation2] sm:$0xff] %vm206_vm0, %v640_v0 }
  0x51 PF: > { %v504_v1 = vld [vmem:[#allocation6 + $0x8] sm:$0xff]   ;;  %v641_v2 = vmov 0.0   ;;  %v505_v3 = vld [vmem:[#allocation6] sm:$0xff]   ;;  %vm642_vm1 = vmmov 0   ;;  %vm234_vm2 = vcmask 261120   ;;  %s643_s22 = smov 64  }
  0x52   : > { %431 = vmatprep.subr.bf16.mxu0 %v641_v2  ;;  %435 = vmatprep.mubr.msk.bf16.mxu0 %vm642_vm1, %v641_v2  ;;  %v419_v6 = vld [vmem:[%s849_s2] ss:$0 sm:$0xff]  ;;  %v209_v12 = vld [vmem:[%s778_s27] sm:$0xff]  ;;  %s644_s23 = smov 96   ;;  %s645_s25 = smov 32  }
  0x53   : > { %432 = vmatpush3.bf16.msra.mxu0 %v504_v1  ;;  %s425_s28 = sshll.u32 %s688_s16, 7  ;;  %s328_s29 = sshll.u32 %s788_s20, 4  ;;  %s804_s29 = int_to_ptr.vmem [resolvable:$true] %s328_s29 }
  0x54   : > { %433 = vmatprep.subr.bf16.mxu0 %v641_v2  ;;  %s802_s8 = scalar_lea.hbm %s850_s3, %s425_s28  ;;  %s315_s7 = scalar_lea.sflag [#allocation5], %s774_s11 }
  0x55   : > { %s566_s9 = scalar_lea.vmem %s804_s29, 128  ;;  %p867_p11 = scmp.ne.s32.totalorder %s860_s6, 0 }
  0x56   : > { %p567_p3 = scmp.ne.s32.totalorder %s804_s29, %s566_s9  ;;  %s646_s16 = smov [#allocation8]  }
  0x57   : > { %v208_v4 = vld [vmem:[#allocation2] sm:$0xff]  ;;  %434 = vmatpush3.bf16.msra.mxu0 %v505_v3  ;;  %s570_s10 = sshll.u32 %s646_s16, 4  ;;  %s571_s10 = int_to_ptr.vmem [resolvable:$false] %s570_s10 }
  0x58   : > { %v210_v5 = vpack.c.bf16 %v208_v4, %v208_v4  ;;  %p568_p7 = pnand %p567_p3, %p867_p11  ;;  %s572_s21 = scalar_lea.vmem %s571_s10, 256 }
  0x59   : > { %p573_p2 = scmp.lt.s32.totalorder %s804_s29, %s571_s10  ;;  %p574_p13 = scmp.lt.s32.totalorder %s572_s21, %s566_s9 }
  0x5a   : > { %436 = vmatmul.mubr.msk.bf16.vlgmr.msra.gmra.mxu0 %vm234_vm2, %v210_v5  ;;  %p569_p8 = pneg %p568_p7 }
  0x5b   : > { %p575_p0 = por %p574_p13, %p573_p2 }
  0x5d   : > { %p576_p5 = pnand %p575_p0, %p569_p8 }
 0x11a   : > { %v272_v7 = vpop.f32.mrf.mxu0 }
 0x11b   : > { %v273_v8 = vadd.f32 %v419_v6, %v272_v7 }
 0x11c   : > { %v437_v9 = vpop.f32.mrf.mxu0 }
 0x11d   : > { %286 = vrot.lane.b32.xlu0 %v273_v8, %s643_s22  ;;  %v278_v13 = vadd.f32 %v273_v8, %v209_v12 }
 0x11e   : > { %v275_v10 = vpop.f32.mrf.mxu0 }
 0x11f   : > { %v423_v14 = vmul.f32 -1.442695, %v278_v13 }
 0x120   : > { %v438_v11 = vpop.f32.mrf.mxu0 }
 0x121   : > { %506 = vpow2.f32 %v423_v14 }
 0x12e   : > { %v507_v15 = vpop.eup %506 }
 0x12f   : > { %v282_v16 = vadd.f32 1.0, %v507_v15 }
 0x131   : > { %508 = vrcp.f32 %v282_v16 }
 0x13e   : > { %v509_v17 = vpop.eup %508 }
 0x13f   : > { %v296_v24 = vsub.f32 1.0, %v509_v17 }
 0x18f   : > { %v287_v18 = vpop.permute.xlu0 %286 }
 0x190   : > { %v289_v19 = vmul.f32 %v509_v17, %v287_v18 }
 0x192   : > { %291 = vrot.lane.b32.xlu0 %v289_v19, %s643_s22 }
 0x204   : > { %v292_v20 = vpop.permute.xlu0 %291 }
 0x205   : > { %v294_v21 = vadd.f32 %v292_v20, %v209_v12 }
 0x207   : > { %510 = vtanh.f32 %v294_v21 }
 0x214   : > { %v511_v22 = vpop.eup %510 }
 0x215   : > { %298 = vrot.lane.b32.xlu1 %v511_v22, %s644_s23 }
 0x219   : > { %303 = vrot.lane.b32.xlu1 %v208_v4, %s645_s25 }
 0x287   : > { %v299_v23 = vpop.permute.xlu1 %298 }
 0x288   : > { %v301_v26 = vmul.f32 %v299_v23, %v296_v24 }
 0x28b   : > { %v304_v25 = vpop.permute.xlu1 %303 }
 0x28c   : > { %v306_v27 = vmul.f32 %v509_v17, %v304_v25 }
 0x28e   : > { %v307_v28 = vadd.f32 %v306_v27, %v301_v26 }
 0x290   : > { %309 = vrot.lane.b32.xlu0 %v307_v28, %s644_s23 }
 0x302   : > { %v310_v29 = vpop.permute.xlu0 %309 }
 0x303   : > { %312 = vst.msk [vmem:[#allocation2] sm:$0xff] %vm234_vm2, %v310_v29  ;;  %313 = vst.msk [vmem:[%s788_s20] sm:$0xff] %vm234_vm2, %v310_v29 }
 0x304   : > { %579 = shalt.err (!%p576_p5)
}
 0x305   : > { %s580_s26 = scalar_lea.hbm %s802_s8, 128  ;;  %s584_s20 = scalar_lea.hbm %s850_s3, 1024 }
 0x306   : > { %p581_p10 = scmp.ne.s32.totalorder %s802_s8, %s580_s26  ;;  %p585_p4 = scmp.lt.s32.totalorder %s802_s8, %s850_s3 }
 0x307   : > { %p586_p6 = scmp.lt.s32.totalorder %s584_s20, %s580_s26 }
 0x308   : > { %p582_p12 = pnand %p581_p10, %p867_p11 }
 0x309   : > { %p587_p9 = por %p586_p6, %p585_p4 }
 0x30a   : > { %p583_p1 = pneg %p582_p12 }
 0x30c   : > { %p588_p3 = pnand %p587_p9, %p583_p1 }
 0x30e   : > { %591 = shalt.err (!%p588_p3)
}
 0x30f   : > { %445 = dma.vmem_to_hbm [thread:$0]  (%p867_p11), %s804_s29, 128, %s802_s8, %s315_s7  }
 0x310 PF: > { %p462_p7 = scmp.ge.s32.totalorder %s634_s15, 2  ;;  %s340_s22 = sand.u32 1, %s622_s12  }
 0x311   : > { %p868_p8 = scmp.ne.s32.totalorder %s856_s19, 0  ;;  %s341_s23 = scalar_lea.sflag [#allocation5], %s340_s22 }
 0x313   : > { %p456_p2 = pnand %p462_p7, %p868_p8 }
 0x315   : > { %p457_p13 = pneg %p456_p2 }
 0x317   : > { %617 = dma.done.wait (%p457_p13), %s341_s23, 128  }
 0x318   : > { %619 = vsyncadd (%p457_p13), %s341_s23, 4294967168  ;;  %p17_p0 = scmp.ge.s32.totalorder %s721_s24, 10   ;;  %s869_s12 = smov %s626_s13 }
 0x319   : > { %s870_s13 = smov %s630_s14  ;;  %s871_s14 = smov %s738_s5 }
 0x31a   : > { %s872_s15 = smov %s721_s24  ;;  %19 = sbr.rel (!%p17_p0) target bundleno = 6 (0x6), region = 85 }
 0x31f   :  { %346 = vsyncpa [#allocation4], 1 }
 0x320   :  { %348 = vsyncpa [#allocation4 + $0x1], 1 }
 0x321   :  { %349 = vsyncpa [#allocation7], 1 }
 0x322   :  { %350 = vsyncpa [#allocation5], 1 }
 0x323   :  { %352 = vsyncpa [#allocation5 + $0x1], 1 }

</bundles_post_ra>
